<compile_context>
chip_gen: v5e
topology: v5e:2x2
jax: 0.10.0
libtpu: 0.0.40
codegen_flags: <defaults>
</compile_context>

<pallas_src>
import functools

import jax
import jax.numpy as jnp
from jax.experimental import pallas as pl
from jax.experimental.pallas import tpu as pltpu

NR_LAYERS = 100     # `ls=100` in GlowLikeCouplingBlock
HIDDEN = 50         # hidden width of the conditional net
LANES = 128
L_PAD = 128         # NR_LAYERS padded up to a lane boundary


def _round_up(n, m):
    return (n + m - 1) // m * m


def cn_fused_kernel(x_ref, w1_ref, b1_ref, w2_ref, b2_ref, y_ref, lj_ref,
                    *, n_blocks, D, Lp):
    """Fused forward of all GlowLike blocks (s1 then s2 per block).

    x_ref  : (TB, 2*D)              batch tile of inputs
    w1_ref : (2*n_blocks, D, H)     first Linear of each conditional net
    b1_ref : (2*n_blocks, 1, H)
    w2_ref : (2*n_blocks, H, OUT_P) second Linear, lane-aligned padded layout
    b2_ref : (2*n_blocks, 1, OUT_P)
    y_ref  : (TB, 2*D)              transformed output
    lj_ref : (TB, 2*D)              accumulated log |dy/dx|
    """
    x = x_ref[...]
    TB = x.shape[0]

    def coupling(xin, cond, idx):
        # conditional net: Linear -> ReLU -> Linear (single fused layer-2 matmul)
        h = jnp.maximum(
            jnp.dot(cond, w1_ref[idx], preferred_element_type=jnp.float32)
            + b1_ref[idx], 0.0)                                        # (TB, H)
        p = (jnp.dot(h, w2_ref[idx], preferred_element_type=jnp.float32)
             + b2_ref[idx])                                            # (TB, OUT_P)

        # lane-aligned slices (every offset is a multiple of 128 -> free views)
        mat1 = p[:, 0:D * Lp]
        bias1 = p[:, D * Lp:2 * D * Lp]
        mat2 = p[:, 2 * D * Lp:3 * D * Lp]
        vec = p[:, 3 * D * Lp:3 * D * Lp + 3 * D]
        bias2, eps, alpha = vec[:, 0:D], vec[:, D:2 * D], vec[:, 2 * D:3 * D]

        # broadcast each transformed feature over its Lp-lane block
        x_rep = jnp.concatenate(
            [jnp.broadcast_to(xin[:, d:d + 1], (TB, Lp)) for d in range(D)],
            axis=1)                                                    # (TB, D*Lp)

        z = x_rep * mat1 + bias1
        e = jnp.exp(jnp.minimum(z, 0.0))          # shared by ELU and ELU'
        elu = jnp.where(z > 0, z, e - 1.0)
        m1m2 = mat1 * mat2

        def seg_sum(t):   # per-feature sum over the (zero-padded) L axis
            return jnp.concatenate(
                [jnp.sum(t[:, d * Lp:(d + 1) * Lp], axis=1, keepdims=True)
                 for d in range(D)], axis=1)                           # (TB, D)

        s_fwd = seg_sum(mat2 * elu)
        s_der = seg_sum(e * m1m2)
        divisor = seg_sum(jnp.maximum(-m1m2, 0.0)) + 1.0

        # one reciprocal (EUP), reused by transform and derivative
        r = 0.8 * jax.nn.sigmoid(eps) * pl.reciprocal(divisor, approx=True)
        y = jnp.exp(alpha) * (xin + r * s_fwd) + bias2
        lj = alpha + jnp.log1p(r * s_der)
        return y, lj

    lj_acc = jnp.zeros_like(x)
    for b in range(n_blocks):
        x1, x2 = x[:, :D], x[:, D:]
        y1, lj1 = coupling(x1, x2, 2 * b)          # s1(x1 | x2)
        # s2 conditions on y1.detach(); identical in the forward pass.
        y2, lj2 = coupling(x2, y1, 2 * b + 1)      # s2(x2 | y1)
        x = jnp.concatenate([y1, y2], axis=1)
        lj_acc = lj_acc + jnp.concatenate([lj1, lj2], axis=1)

    # single lane-dense stores (no per-column masked writes)
    y_ref[...] = x
    lj_ref[...] = lj_acc


def cn_forward(x, w1_all, b1_all, w2_all, b2_all, *, n_blocks, max_tile_b=256):
    """Whole-model forward: one pallas_call for all blocks, batch-tiled grid."""
    # TODO(synk): reverse path (rev=True, Newton-iteration inverse) not implemented.
    B, n_dim = x.shape
    D = n_dim // 2
    Lp = L_PAD

    if B <= max_tile_b:
        tile_b, Bp = B, B
    else:
        tile_b = max_tile_b
        Bp = _round_up(B, tile_b)
    xp = x if Bp == B else jnp.pad(x, ((0, Bp - B), (0, 0)))

    kernel = functools.partial(cn_fused_kernel, n_blocks=n_blocks, D=D, Lp=Lp)
    rep3 = lambda a: pl.BlockSpec(a.shape, lambda i: (0, 0, 0))
    bspec = pl.BlockSpec((tile_b, n_dim), lambda i: (i, 0))

    y, lj = pl.pallas_call(
        kernel,
        out_shape=(jax.ShapeDtypeStruct((Bp, n_dim), jnp.float32),
                   jax.ShapeDtypeStruct((Bp, n_dim), jnp.float32)),
        grid=(Bp // tile_b,),
        in_specs=[bspec, rep3(w1_all), rep3(b1_all), rep3(w2_all), rep3(b2_all)],
        out_specs=(bspec, bspec),
        compiler_params=pltpu.CompilerParams(
            dimension_semantics=("parallel",)),
    )(xp, w1_all, b1_all, w2_all, b2_all)
    return y[:B], lj[:B]


# ----------------------- host-side parameter handling -----------------------

def init_coupling_params(key, dim, dim_cond, L=NR_LAYERS, hidden=HIDDEN):
    """Raw (unpadded) params of Sequential(Linear(dim_cond,50), ReLU, Linear(50, 3*dim*(L+1)))."""
    k1, k2, k3, k4 = jax.random.split(key, 4)
    out = 3 * dim * (L + 1)
    w1 = jax.random.normal(k1, (dim_cond, hidden), jnp.float32) / jnp.sqrt(dim_cond)
    b1 = jax.random.normal(k2, (1, hidden), jnp.float32) * 0.1
    w2 = jax.random.normal(k3, (hidden, out), jnp.float32) / jnp.sqrt(hidden)
    b2 = jax.random.normal(k4, (1, out), jnp.float32) * 0.1
    return (w1, b1, w2, b2)


def pad_layer2(w2, b2, D, L, Lp, out_p):
    """Re-lay layer-2 output columns so each per-feature mat1/bias1/mat2 block
    starts on a 128-lane boundary.
    INVARIANT: mat2 pad columns AND their b2 entries are zero => all L-sums are
    exactly unchanged. mat1/bias1 pads are also zero (harmless: every summed
    term carries a mat2 factor)."""
    H = w2.shape[0]
    w2p = jnp.zeros((H, out_p), jnp.float32)
    b2p = jnp.zeros((1, out_p), jnp.float32)
    for blk in range(3):                      # mat1, bias1, mat2
        for d in range(D):
            src = (blk * D + d) * L
            dst = (blk * D + d) * Lp
            w2p = w2p.at[:, dst:dst + L].set(w2[:, src:src + L])
            b2p = b2p.at[:, dst:dst + L].set(b2[:, src:src + L])
    # vector-like params (bias2, eps, alpha) right after the mat blocks
    w2p = w2p.at[:, 3 * D * Lp:3 * D * Lp + 3 * D].set(w2[:, 3 * D * L:])
    b2p = b2p.at[:, 3 * D * Lp:3 * D * Lp + 3 * D].set(b2[:, 3 * D * L:])
    return w2p, b2p


def pack_params(blocks_params, D, L=NR_LAYERS, Lp=L_PAD):
    """Stack per-coupling params in order (b0.s1, b0.s2, b1.s1, ...) and pad L."""
    out_p = 3 * D * Lp + _round_up(3 * D, LANES)
    w1s, b1s, w2s, b2s = [], [], [], []
    for (p_s1, p_s2) in blocks_params:
        for (w1, b1, w2, b2) in (p_s1, p_s2):
            w2p, b2p = pad_layer2(w2, b2, D, L, Lp, out_p)
            w1s.append(w1); b1s.append(b1); w2s.append(w2p); b2s.append(b2p)
    return (jnp.stack(w1s), jnp.stack(b1s), jnp.stack(w2s), jnp.stack(b2s))


# ------------------------- pure-JAX reference (check) ------------------------

def _coupling_ref(xp, cond, params, D, L):
    w1, b1, w2, b2 = params
    h = jnp.maximum(cond @ w1 + b1, 0.0)
    p = h @ w2 + b2
    mat1 = p[:, 0:D * L].reshape(-1, D, L)
    bias1 = p[:, D * L:2 * D * L].reshape(-1, D, L)
    mat2 = p[:, 2 * D * L:3 * D * L].reshape(-1, D, L)
    bias2 = p[:, 3 * D * L:3 * D * L + D]
    eps = p[:, 3 * D * L + D:3 * D * L + 2 * D]
    alpha = p[:, 3 * D * L + 2 * D:]
    z = xp[:, :, None] * mat1 + bias1
    zn = jnp.minimum(z, 0.0)
    elu = jnp.where(z > 0, z, jnp.exp(zn) - 1.0)
    s_fwd = jnp.sum(mat2 * elu, axis=2)
    s_der = jnp.sum(jnp.exp(zn) * mat1 * mat2, axis=2)
    div = jnp.sum(jnp.maximum(-mat1 * mat2, 0.0), axis=2) + 1.0
    sig = jax.nn.sigmoid(eps)
    ea = jnp.exp(alpha)
    y = ea * (xp + 0.8 * sig * s_fwd / div) + bias2
    lj = jnp.log(ea * (1.0 + 0.8 * sig * s_der / div))
    return y, lj


def cn_forward_ref(x, blocks_params, D, L=NR_LAYERS):
    lj_acc = jnp.zeros_like(x)
    for (p_s1, p_s2) in blocks_params:
        x1, x2 = x[:, :D], x[:, D:]
        y1, lj1 = _coupling_ref(x1, x2, p_s1, D, L)
        y2, lj2 = _coupling_ref(x2, y1, p_s2, D, L)
        x = jnp.concatenate([y1, y2], axis=1)
        lj_acc = lj_acc + jnp.concatenate([lj1, lj2], axis=1)
    return x, lj_acc


if __name__ == "__main__":
    key = jax.random.PRNGKey(0)
    B, N_DIM, N_BLOCKS = 8, 4, 1        # even N_DIM (split_len1 == split_len2)
    D = N_DIM // 2

    kx, kparams = jax.random.split(key)
    x = jax.random.normal(kx, (B, N_DIM), jnp.float32)

    blocks_params = []
    bkeys = jax.random.split(kparams, N_BLOCKS)
    for i in range(N_BLOCKS):
        ks1, ks2 = jax.random.split(bkeys[i])
        p_s1 = init_coupling_params(ks1, dim=D, dim_cond=D)
        p_s2 = init_coupling_params(ks2, dim=D, dim_cond=D)
        blocks_params.append((p_s1, p_s2))

    w1_all, b1_all, w2_all, b2_all = pack_params(blocks_params, D)

    y, log_jac = cn_forward(x, w1_all, b1_all, w2_all, b2_all, n_blocks=N_BLOCKS)
    jax.block_until_ready(y)
    jax.block_until_ready(log_jac)
    assert y.shape == (B, N_DIM) and log_jac.shape == (B, N_DIM)

    # sanity check vs. a straightforward pure-JAX reference (tolerance covers the
    # approximate EUP reciprocal used in-kernel)
    y_exp, lj_exp = cn_forward_ref(x, blocks_params, D)
    assert jnp.allclose(y, y_exp, rtol=1e-2, atol=1e-2), \
        float(jnp.max(jnp.abs(y - y_exp)))
    assert jnp.allclose(log_jac, lj_exp, rtol=1e-2, atol=1e-2), \
        float(jnp.max(jnp.abs(log_jac - lj_exp)))

    print("KERNEL_OK")
</pallas_src>

<mosaic_0001>
module attributes {stable_mosaic.version = 11 : i64} {
  func.func @cn_fused_kernel(%arg0: i32, %arg1: memref<8x4xf32, #tpu.memory_space<vmem>>, %arg2: memref<2x2x50xf32, #tpu.memory_space<vmem>>, %arg3: memref<2x1x50xf32, #tpu.memory_space<vmem>>, %arg4: memref<2x50x896xf32, #tpu.memory_space<vmem>>, %arg5: memref<2x1x896xf32, #tpu.memory_space<vmem>>, %arg6: memref<8x4xf32, #tpu.memory_space<vmem>>, %arg7: memref<8x4xf32, #tpu.memory_space<vmem>>) attributes {dimension_semantics = [#tpu.dimension_semantics<parallel>], iteration_bounds = array<i64: 1>, scalar_prefetch = 0 : i64, scratch_operands = 0 : i64, tpu.core_type = #tpu.core_type<tc>, window_params = [{transform_indices = @transform_0, window_bounds = array<i64: 8, 4>}, {pipeline_mode = #tpu.pipeline_mode<synchronous>, transform_indices = @transform_1, window_bounds = array<i64: 2, 2, 50>}, {pipeline_mode = #tpu.pipeline_mode<synchronous>, transform_indices = @transform_2, window_bounds = array<i64: 2, 1, 50>}, {pipeline_mode = #tpu.pipeline_mode<synchronous>, transform_indices = @transform_3, window_bounds = array<i64: 2, 50, 896>}, {pipeline_mode = #tpu.pipeline_mode<synchronous>, transform_indices = @transform_4, window_bounds = array<i64: 2, 1, 896>}, {transform_indices = @transform_5, window_bounds = array<i64: 8, 4>}, {transform_indices = @transform_6, window_bounds = array<i64: 8, 4>}]} {
    %c0 = arith.constant 0 : index
    %c0_0 = arith.constant 0 : index
    %0 = vector.load %arg1[%c0, %c0_0] : memref<8x4xf32, #tpu.memory_space<vmem>>, vector<8x4xf32>
    %cst = arith.constant 0.000000e+00 : f32
    %1 = vector.broadcast %cst : f32 to vector<8x4xf32>
    %2 = vector.extract_strided_slice %0 {offsets = [0, 0], sizes = [8, 2], strides = [1, 1]} : vector<8x4xf32> to vector<8x2xf32>
    %3 = vector.extract_strided_slice %0 {offsets = [0, 2], sizes = [8, 2], strides = [1, 1]} : vector<8x4xf32> to vector<8x2xf32>
    %c0_1 = arith.constant 0 : index
    %c0_2 = arith.constant 0 : index
    %c0_3 = arith.constant 0 : index
    %4 = vector.load %arg2[%c0_1, %c0_2, %c0_3] : memref<2x2x50xf32, #tpu.memory_space<vmem>>, vector<1x2x50xf32>
    %5 = vector.shape_cast %4 : vector<1x2x50xf32> to vector<2x50xf32>
    %cst_4 = arith.constant dense<0.000000e+00> : vector<8x50xf32>
    %6 = tpu.matmul %3, %5, %cst_4 {dimension_numbers = #tpu.dot_dimension_numbers<[1], [0], [0], [1], [0, 0, 1, 1], [], []>} : vector<8x2xf32>, vector<2x50xf32>, vector<8x50xf32> -> vector<8x50xf32>
    %c0_5 = arith.constant 0 : index
    %c0_6 = arith.constant 0 : index
    %c0_7 = arith.constant 0 : index
    %7 = vector.load %arg3[%c0_5, %c0_6, %c0_7] : memref<2x1x50xf32, #tpu.memory_space<vmem>>, vector<1x1x50xf32>
    %8 = vector.shape_cast %7 : vector<1x1x50xf32> to vector<1x50xf32>
    %9 = vector.broadcast %8 : vector<1x50xf32> to vector<8x50xf32>
    %10 = arith.addf %6, %9 : vector<8x50xf32>
    %cst_8 = arith.constant 0.000000e+00 : f32
    %11 = vector.broadcast %cst_8 : f32 to vector<8x50xf32>
    %12 = arith.maximumf %10, %11 : vector<8x50xf32>
    %c0_9 = arith.constant 0 : index
    %c0_10 = arith.constant 0 : index
    %c0_11 = arith.constant 0 : index
    %13 = vector.load %arg4[%c0_9, %c0_10, %c0_11] : memref<2x50x896xf32, #tpu.memory_space<vmem>>, vector<1x50x896xf32>
    %14 = vector.shape_cast %13 : vector<1x50x896xf32> to vector<50x896xf32>
    %cst_12 = arith.constant dense<0.000000e+00> : vector<8x896xf32>
    %15 = tpu.matmul %12, %14, %cst_12 {dimension_numbers = #tpu.dot_dimension_numbers<[1], [0], [0], [1], [0, 0, 1, 1], [], []>} : vector<8x50xf32>, vector<50x896xf32>, vector<8x896xf32> -> vector<8x896xf32>
    %c0_13 = arith.constant 0 : index
    %c0_14 = arith.constant 0 : index
    %c0_15 = arith.constant 0 : index
    %16 = vector.load %arg5[%c0_13, %c0_14, %c0_15] : memref<2x1x896xf32, #tpu.memory_space<vmem>>, vector<1x1x896xf32>
    %17 = vector.shape_cast %16 : vector<1x1x896xf32> to vector<1x896xf32>
    %18 = vector.broadcast %17 : vector<1x896xf32> to vector<8x896xf32>
    %19 = arith.addf %15, %18 : vector<8x896xf32>
    %20 = vector.extract_strided_slice %19 {offsets = [0, 0], sizes = [8, 256], strides = [1, 1]} : vector<8x896xf32> to vector<8x256xf32>
    %21 = vector.extract_strided_slice %19 {offsets = [0, 256], sizes = [8, 256], strides = [1, 1]} : vector<8x896xf32> to vector<8x256xf32>
    %22 = vector.extract_strided_slice %19 {offsets = [0, 512], sizes = [8, 256], strides = [1, 1]} : vector<8x896xf32> to vector<8x256xf32>
    %23 = vector.extract_strided_slice %19 {offsets = [0, 768], sizes = [8, 6], strides = [1, 1]} : vector<8x896xf32> to vector<8x6xf32>
    %24 = vector.extract_strided_slice %23 {offsets = [0, 0], sizes = [8, 2], strides = [1, 1]} : vector<8x6xf32> to vector<8x2xf32>
    %25 = vector.extract_strided_slice %23 {offsets = [0, 2], sizes = [8, 2], strides = [1, 1]} : vector<8x6xf32> to vector<8x2xf32>
    %26 = vector.extract_strided_slice %23 {offsets = [0, 4], sizes = [8, 2], strides = [1, 1]} : vector<8x6xf32> to vector<8x2xf32>
    %27 = vector.extract_strided_slice %2 {offsets = [0, 0], sizes = [8, 1], strides = [1, 1]} : vector<8x2xf32> to vector<8x1xf32>
    %28 = vector.shape_cast %27 : vector<8x1xf32> to vector<8x1xf32>
    %29 = vector.broadcast %28 : vector<8x1xf32> to vector<8x128xf32>
    %30 = vector.extract_strided_slice %2 {offsets = [0, 1], sizes = [8, 1], strides = [1, 1]} : vector<8x2xf32> to vector<8x1xf32>
    %31 = vector.shape_cast %30 : vector<8x1xf32> to vector<8x1xf32>
    %32 = vector.broadcast %31 : vector<8x1xf32> to vector<8x128xf32>
    %33 = tpu.concatenate %29, %32 in 1 : vector<8x128xf32>, vector<8x128xf32> -> vector<8x256xf32>
    %34 = arith.mulf %33, %20 : vector<8x256xf32>
    %35 = arith.addf %34, %21 : vector<8x256xf32>
    %cst_16 = arith.constant 0.000000e+00 : f32
    %36 = vector.broadcast %cst_16 : f32 to vector<8x256xf32>
    %37 = arith.minimumf %35, %36 : vector<8x256xf32>
    %38 = math.exp %37 : vector<8x256xf32>
    %cst_17 = arith.constant 0.000000e+00 : f32
    %39 = vector.broadcast %cst_17 : f32 to vector<8x256xf32>
    %40 = arith.cmpf ogt, %35, %39 : vector<8x256xf32>
    %cst_18 = arith.constant 1.000000e+00 : f32
    %41 = vector.broadcast %cst_18 : f32 to vector<8x256xf32>
    %42 = arith.subf %38, %41 : vector<8x256xf32>
    %43 = arith.select %40, %35, %42 : vector<8x256xi1>, vector<8x256xf32>
    %44 = arith.mulf %20, %22 : vector<8x256xf32>
    %45 = arith.mulf %22, %43 : vector<8x256xf32>
    %46 = vector.extract_strided_slice %45 {offsets = [0, 0], sizes = [8, 128], strides = [1, 1]} : vector<8x256xf32> to vector<8x128xf32>
    %cst_19 = arith.constant dense<0.000000e+00> : vector<8xf32>
    %47 = vector.multi_reduction <add>, %46, %cst_19 [1] : vector<8x128xf32> to vector<8xf32>
    %48 = vector.shape_cast %47 : vector<8xf32> to vector<8x1xf32>
    %49 = vector.extract_strided_slice %45 {offsets = [0, 128], sizes = [8, 128], strides = [1, 1]} : vector<8x256xf32> to vector<8x128xf32>
    %cst_20 = arith.constant dense<0.000000e+00> : vector<8xf32>
    %50 = vector.multi_reduction <add>, %49, %cst_20 [1] : vector<8x128xf32> to vector<8xf32>
    %51 = vector.shape_cast %50 : vector<8xf32> to vector<8x1xf32>
    %52 = tpu.concatenate %48, %51 in 1 : vector<8x1xf32>, vector<8x1xf32> -> vector<8x2xf32>
    %53 = arith.mulf %38, %44 : vector<8x256xf32>
    %54 = vector.extract_strided_slice %53 {offsets = [0, 0], sizes = [8, 128], strides = [1, 1]} : vector<8x256xf32> to vector<8x128xf32>
    %cst_21 = arith.constant dense<0.000000e+00> : vector<8xf32>
    %55 = vector.multi_reduction <add>, %54, %cst_21 [1] : vector<8x128xf32> to vector<8xf32>
    %56 = vector.shape_cast %55 : vector<8xf32> to vector<8x1xf32>
    %57 = vector.extract_strided_slice %53 {offsets = [0, 128], sizes = [8, 128], strides = [1, 1]} : vector<8x256xf32> to vector<8x128xf32>
    %cst_22 = arith.constant dense<0.000000e+00> : vector<8xf32>
    %58 = vector.multi_reduction <add>, %57, %cst_22 [1] : vector<8x128xf32> to vector<8xf32>
    %59 = vector.shape_cast %58 : vector<8xf32> to vector<8x1xf32>
    %60 = tpu.concatenate %56, %59 in 1 : vector<8x1xf32>, vector<8x1xf32> -> vector<8x2xf32>
    %cst_23 = arith.constant 0.000000e+00 : f32
    %61 = vector.broadcast %cst_23 : f32 to vector<8x256xf32>
    %62 = arith.subf %61, %44 : vector<8x256xf32>
    %cst_24 = arith.constant 0.000000e+00 : f32
    %63 = vector.broadcast %cst_24 : f32 to vector<8x256xf32>
    %64 = arith.maximumf %62, %63 : vector<8x256xf32>
    %65 = vector.extract_strided_slice %64 {offsets = [0, 0], sizes = [8, 128], strides = [1, 1]} : vector<8x256xf32> to vector<8x128xf32>
    %cst_25 = arith.constant dense<0.000000e+00> : vector<8xf32>
    %66 = vector.multi_reduction <add>, %65, %cst_25 [1] : vector<8x128xf32> to vector<8xf32>
    %67 = vector.shape_cast %66 : vector<8xf32> to vector<8x1xf32>
    %68 = vector.extract_strided_slice %64 {offsets = [0, 128], sizes = [8, 128], strides = [1, 1]} : vector<8x256xf32> to vector<8x128xf32>
    %cst_26 = arith.constant dense<0.000000e+00> : vector<8xf32>
    %69 = vector.multi_reduction <add>, %68, %cst_26 [1] : vector<8x128xf32> to vector<8xf32>
    %70 = vector.shape_cast %69 : vector<8xf32> to vector<8x1xf32>
    %71 = tpu.concatenate %67, %70 in 1 : vector<8x1xf32>, vector<8x1xf32> -> vector<8x2xf32>
    %cst_27 = arith.constant 1.000000e+00 : f32
    %72 = vector.broadcast %cst_27 : f32 to vector<8x2xf32>
    %73 = arith.addf %71, %72 : vector<8x2xf32>
    %74 = arith.negf %25 : vector<8x2xf32>
    %75 = math.exp %74 : vector<8x2xf32>
    %cst_28 = arith.constant 1.000000e+00 : f32
    %76 = vector.broadcast %cst_28 : f32 to vector<8x2xf32>
    %77 = arith.addf %76, %75 : vector<8x2xf32>
    %78 = arith.divf %76, %77 : vector<8x2xf32>
    %cst_29 = arith.constant 8.000000e-01 : f32
    %79 = vector.broadcast %cst_29 : f32 to vector<8x2xf32>
    %80 = arith.mulf %79, %78 : vector<8x2xf32>
    %81 = tpu.reciprocal %73 {approx = true} : vector<8x2xf32> -> vector<8x2xf32>
    %82 = arith.mulf %80, %81 : vector<8x2xf32>
    %83 = math.exp %26 : vector<8x2xf32>
    %84 = arith.mulf %82, %52 : vector<8x2xf32>
    %85 = arith.addf %2, %84 : vector<8x2xf32>
    %86 = arith.mulf %83, %85 : vector<8x2xf32>
    %87 = arith.addf %86, %24 : vector<8x2xf32>
    %88 = arith.mulf %82, %60 : vector<8x2xf32>
    %89 = math.log1p %88 : vector<8x2xf32>
    %90 = arith.addf %26, %89 : vector<8x2xf32>
    %c1 = arith.constant 1 : index
    %c0_30 = arith.constant 0 : index
    %c0_31 = arith.constant 0 : index
    %91 = vector.load %arg2[%c1, %c0_30, %c0_31] : memref<2x2x50xf32, #tpu.memory_space<vmem>>, vector<1x2x50xf32>
    %92 = vector.shape_cast %91 : vector<1x2x50xf32> to vector<2x50xf32>
    %cst_32 = arith.constant dense<0.000000e+00> : vector<8x50xf32>
    %93 = tpu.matmul %87, %92, %cst_32 {dimension_numbers = #tpu.dot_dimension_numbers<[1], [0], [0], [1], [0, 0, 1, 1], [], []>} : vector<8x2xf32>, vector<2x50xf32>, vector<8x50xf32> -> vector<8x50xf32>
    %c1_33 = arith.constant 1 : index
    %c0_34 = arith.constant 0 : index
    %c0_35 = arith.constant 0 : index
    %94 = vector.load %arg3[%c1_33, %c0_34, %c0_35] : memref<2x1x50xf32, #tpu.memory_space<vmem>>, vector<1x1x50xf32>
    %95 = vector.shape_cast %94 : vector<1x1x50xf32> to vector<1x50xf32>
    %96 = vector.broadcast %95 : vector<1x50xf32> to vector<8x50xf32>
    %97 = arith.addf %93, %96 : vector<8x50xf32>
    %cst_36 = arith.constant 0.000000e+00 : f32
    %98 = vector.broadcast %cst_36 : f32 to vector<8x50xf32>
    %99 = arith.maximumf %97, %98 : vector<8x50xf32>
    %c1_37 = arith.constant 1 : index
    %c0_38 = arith.constant 0 : index
    %c0_39 = arith.constant 0 : index
    %100 = vector.load %arg4[%c1_37, %c0_38, %c0_39] : memref<2x50x896xf32, #tpu.memory_space<vmem>>, vector<1x50x896xf32>
    %101 = vector.shape_cast %100 : vector<1x50x896xf32> to vector<50x896xf32>
    %cst_40 = arith.constant dense<0.000000e+00> : vector<8x896xf32>
    %102 = tpu.matmul %99, %101, %cst_40 {dimension_numbers = #tpu.dot_dimension_numbers<[1], [0], [0], [1], [0, 0, 1, 1], [], []>} : vector<8x50xf32>, vector<50x896xf32>, vector<8x896xf32> -> vector<8x896xf32>
    %c1_41 = arith.constant 1 : index
    %c0_42 = arith.constant 0 : index
    %c0_43 = arith.constant 0 : index
    %103 = vector.load %arg5[%c1_41, %c0_42, %c0_43] : memref<2x1x896xf32, #tpu.memory_space<vmem>>, vector<1x1x896xf32>
    %104 = vector.shape_cast %103 : vector<1x1x896xf32> to vector<1x896xf32>
    %105 = vector.broadcast %104 : vector<1x896xf32> to vector<8x896xf32>
    %106 = arith.addf %102, %105 : vector<8x896xf32>
    %107 = vector.extract_strided_slice %106 {offsets = [0, 0], sizes = [8, 256], strides = [1, 1]} : vector<8x896xf32> to vector<8x256xf32>
    %108 = vector.extract_strided_slice %106 {offsets = [0, 256], sizes = [8, 256], strides = [1, 1]} : vector<8x896xf32> to vector<8x256xf32>
    %109 = vector.extract_strided_slice %106 {offsets = [0, 512], sizes = [8, 256], strides = [1, 1]} : vector<8x896xf32> to vector<8x256xf32>
    %110 = vector.extract_strided_slice %106 {offsets = [0, 768], sizes = [8, 6], strides = [1, 1]} : vector<8x896xf32> to vector<8x6xf32>
    %111 = vector.extract_strided_slice %110 {offsets = [0, 0], sizes = [8, 2], strides = [1, 1]} : vector<8x6xf32> to vector<8x2xf32>
    %112 = vector.extract_strided_slice %110 {offsets = [0, 2], sizes = [8, 2], strides = [1, 1]} : vector<8x6xf32> to vector<8x2xf32>
    %113 = vector.extract_strided_slice %110 {offsets = [0, 4], sizes = [8, 2], strides = [1, 1]} : vector<8x6xf32> to vector<8x2xf32>
    %114 = vector.extract_strided_slice %3 {offsets = [0, 0], sizes = [8, 1], strides = [1, 1]} : vector<8x2xf32> to vector<8x1xf32>
    %115 = vector.shape_cast %114 : vector<8x1xf32> to vector<8x1xf32>
    %116 = vector.broadcast %115 : vector<8x1xf32> to vector<8x128xf32>
    %117 = vector.extract_strided_slice %3 {offsets = [0, 1], sizes = [8, 1], strides = [1, 1]} : vector<8x2xf32> to vector<8x1xf32>
    %118 = vector.shape_cast %117 : vector<8x1xf32> to vector<8x1xf32>
    %119 = vector.broadcast %118 : vector<8x1xf32> to vector<8x128xf32>
    %120 = tpu.concatenate %116, %119 in 1 : vector<8x128xf32>, vector<8x128xf32> -> vector<8x256xf32>
    %121 = arith.mulf %120, %107 : vector<8x256xf32>
    %122 = arith.addf %121, %108 : vector<8x256xf32>
    %cst_44 = arith.constant 0.000000e+00 : f32
    %123 = vector.broadcast %cst_44 : f32 to vector<8x256xf32>
    %124 = arith.minimumf %122, %123 : vector<8x256xf32>
    %125 = math.exp %124 : vector<8x256xf32>
    %cst_45 = arith.constant 0.000000e+00 : f32
    %126 = vector.broadcast %cst_45 : f32 to vector<8x256xf32>
    %127 = arith.cmpf ogt, %122, %126 : vector<8x256xf32>
    %cst_46 = arith.constant 1.000000e+00 : f32
    %128 = vector.broadcast %cst_46 : f32 to vector<8x256xf32>
    %129 = arith.subf %125, %128 : vector<8x256xf32>
    %130 = arith.select %127, %122, %129 : vector<8x256xi1>, vector<8x256xf32>
    %131 = arith.mulf %107, %109 : vector<8x256xf32>
    %132 = arith.mulf %109, %130 : vector<8x256xf32>
    %133 = vector.extract_strided_slice %132 {offsets = [0, 0], sizes = [8, 128], strides = [1, 1]} : vector<8x256xf32> to vector<8x128xf32>
    %cst_47 = arith.constant dense<0.000000e+00> : vector<8xf32>
    %134 = vector.multi_reduction <add>, %133, %cst_47 [1] : vector<8x128xf32> to vector<8xf32>
    %135 = vector.shape_cast %134 : vector<8xf32> to vector<8x1xf32>
    %136 = vector.extract_strided_slice %132 {offsets = [0, 128], sizes = [8, 128], strides = [1, 1]} : vector<8x256xf32> to vector<8x128xf32>
    %cst_48 = arith.constant dense<0.000000e+00> : vector<8xf32>
    %137 = vector.multi_reduction <add>, %136, %cst_48 [1] : vector<8x128xf32> to vector<8xf32>
    %138 = vector.shape_cast %137 : vector<8xf32> to vector<8x1xf32>
    %139 = tpu.concatenate %135, %138 in 1 : vector<8x1xf32>, vector<8x1xf32> -> vector<8x2xf32>
    %140 = arith.mulf %125, %131 : vector<8x256xf32>
    %141 = vector.extract_strided_slice %140 {offsets = [0, 0], sizes = [8, 128], strides = [1, 1]} : vector<8x256xf32> to vector<8x128xf32>
    %cst_49 = arith.constant dense<0.000000e+00> : vector<8xf32>
    %142 = vector.multi_reduction <add>, %141, %cst_49 [1] : vector<8x128xf32> to vector<8xf32>
    %143 = vector.shape_cast %142 : vector<8xf32> to vector<8x1xf32>
    %144 = vector.extract_strided_slice %140 {offsets = [0, 128], sizes = [8, 128], strides = [1, 1]} : vector<8x256xf32> to vector<8x128xf32>
    %cst_50 = arith.constant dense<0.000000e+00> : vector<8xf32>
    %145 = vector.multi_reduction <add>, %144, %cst_50 [1] : vector<8x128xf32> to vector<8xf32>
    %146 = vector.shape_cast %145 : vector<8xf32> to vector<8x1xf32>
    %147 = tpu.concatenate %143, %146 in 1 : vector<8x1xf32>, vector<8x1xf32> -> vector<8x2xf32>
    %cst_51 = arith.constant 0.000000e+00 : f32
    %148 = vector.broadcast %cst_51 : f32 to vector<8x256xf32>
    %149 = arith.subf %148, %131 : vector<8x256xf32>
    %cst_52 = arith.constant 0.000000e+00 : f32
    %150 = vector.broadcast %cst_52 : f32 to vector<8x256xf32>
    %151 = arith.maximumf %149, %150 : vector<8x256xf32>
    %152 = vector.extract_strided_slice %151 {offsets = [0, 0], sizes = [8, 128], strides = [1, 1]} : vector<8x256xf32> to vector<8x128xf32>
    %cst_53 = arith.constant dense<0.000000e+00> : vector<8xf32>
    %153 = vector.multi_reduction <add>, %152, %cst_53 [1] : vector<8x128xf32> to vector<8xf32>
    %154 = vector.shape_cast %153 : vector<8xf32> to vector<8x1xf32>
    %155 = vector.extract_strided_slice %151 {offsets = [0, 128], sizes = [8, 128], strides = [1, 1]} : vector<8x256xf32> to vector<8x128xf32>
    %cst_54 = arith.constant dense<0.000000e+00> : vector<8xf32>
    %156 = vector.multi_reduction <add>, %155, %cst_54 [1] : vector<8x128xf32> to vector<8xf32>
    %157 = vector.shape_cast %156 : vector<8xf32> to vector<8x1xf32>
    %158 = tpu.concatenate %154, %157 in 1 : vector<8x1xf32>, vector<8x1xf32> -> vector<8x2xf32>
    %cst_55 = arith.constant 1.000000e+00 : f32
    %159 = vector.broadcast %cst_55 : f32 to vector<8x2xf32>
    %160 = arith.addf %158, %159 : vector<8x2xf32>
    %161 = arith.negf %112 : vector<8x2xf32>
    %162 = math.exp %161 : vector<8x2xf32>
    %cst_56 = arith.constant 1.000000e+00 : f32
    %163 = vector.broadcast %cst_56 : f32 to vector<8x2xf32>
    %164 = arith.addf %163, %162 : vector<8x2xf32>
    %165 = arith.divf %163, %164 : vector<8x2xf32>
    %cst_57 = arith.constant 8.000000e-01 : f32
    %166 = vector.broadcast %cst_57 : f32 to vector<8x2xf32>
    %167 = arith.mulf %166, %165 : vector<8x2xf32>
    %168 = tpu.reciprocal %160 {approx = true} : vector<8x2xf32> -> vector<8x2xf32>
    %169 = arith.mulf %167, %168 : vector<8x2xf32>
    %170 = math.exp %113 : vector<8x2xf32>
    %171 = arith.mulf %169, %139 : vector<8x2xf32>
    %172 = arith.addf %3, %171 : vector<8x2xf32>
    %173 = arith.mulf %170, %172 : vector<8x2xf32>
    %174 = arith.addf %173, %111 : vector<8x2xf32>
    %175 = arith.mulf %169, %147 : vector<8x2xf32>
    %176 = math.log1p %175 : vector<8x2xf32>
    %177 = arith.addf %113, %176 : vector<8x2xf32>
    %178 = tpu.concatenate %87, %174 in 1 : vector<8x2xf32>, vector<8x2xf32> -> vector<8x4xf32>
    %179 = tpu.concatenate %90, %177 in 1 : vector<8x2xf32>, vector<8x2xf32> -> vector<8x4xf32>
    %180 = arith.addf %1, %179 : vector<8x4xf32>
    %c0_58 = arith.constant 0 : index
    %c0_59 = arith.constant 0 : index
    %181 = vector.load %arg6[%c0_58, %c0_59] : memref<8x4xf32, #tpu.memory_space<vmem>>, vector<8x4xf32>
    tpu.vector_store %arg6[%c0_58, %c0_59], %178 {strides = array<i32>} : memref<8x4xf32, #tpu.memory_space<vmem>>, vector<8x4xf32>,
    %c0_60 = arith.constant 0 : index
    %c0_61 = arith.constant 0 : index
    %182 = vector.load %arg7[%c0_60, %c0_61] : memref<8x4xf32, #tpu.memory_space<vmem>>, vector<8x4xf32>
    tpu.vector_store %arg7[%c0_60, %c0_61], %180 {strides = array<i32>} : memref<8x4xf32, #tpu.memory_space<vmem>>, vector<8x4xf32>,
    return
  }
  func.func @transform_0(%arg0: i32) -> (i32, i32) {
    %c0_i32 = arith.constant 0 : i32
    %c0_i32_0 = arith.constant 0 : i32
    return %arg0, %c0_i32 : i32, i32
  }
  func.func @transform_1(%arg0: i32) -> (i32, i32, i32) {
    %c0_i32 = arith.constant 0 : i32
    %c0_i32_0 = arith.constant 0 : i32
    %c0_i32_1 = arith.constant 0 : i32
    %c0_i32_2 = arith.constant 0 : i32
    return %c0_i32, %c0_i32_0, %c0_i32_1 : i32, i32, i32
  }
  func.func @transform_2(%arg0: i32) -> (i32, i32, i32) {
    %c0_i32 = arith.constant 0 : i32
    %c0_i32_0 = arith.constant 0 : i32
    %c0_i32_1 = arith.constant 0 : i32
    %c0_i32_2 = arith.constant 0 : i32
    return %c0_i32, %c0_i32_0, %c0_i32_1 : i32, i32, i32
  }
  func.func @transform_3(%arg0: i32) -> (i32, i32, i32) {
    %c0_i32 = arith.constant 0 : i32
    %c0_i32_0 = arith.constant 0 : i32
    %c0_i32_1 = arith.constant 0 : i32
    %c0_i32_2 = arith.constant 0 : i32
    return %c0_i32, %c0_i32_0, %c0_i32_1 : i32, i32, i32
  }
  func.func @transform_4(%arg0: i32) -> (i32, i32, i32) {
    %c0_i32 = arith.constant 0 : i32
    %c0_i32_0 = arith.constant 0 : i32
    %c0_i32_1 = arith.constant 0 : i32
    %c0_i32_2 = arith.constant 0 : i32
    return %c0_i32, %c0_i32_0, %c0_i32_1 : i32, i32, i32
  }
  func.func @transform_5(%arg0: i32) -> (i32, i32) {
    %c0_i32 = arith.constant 0 : i32
    %c0_i32_0 = arith.constant 0 : i32
    return %arg0, %c0_i32 : i32, i32
  }
  func.func @transform_6(%arg0: i32) -> (i32, i32) {
    %c0_i32 = arith.constant 0 : i32
    %c0_i32_0 = arith.constant 0 : i32
    return %arg0, %c0_i32 : i32, i32
  }
}

</mosaic_0001>

<bundles_post_ra>
// kernel: tpu_custom_call.1
= control target key start
LH: loop header
LB: loop body
LE: loop exit
PB: predicated region body
PF: predicated region fallthrough
CT: control target
= control target key end

     0   :  { %vm34_vm0 = vcmask 1041408   ;;  %s946_s25 = smov 126   ;;  %vm31_vm1 = vcmask 15360   ;;  %v947_v53 = vmov 0   ;;  %v948_v54 = vmov 1   ;;  %s950_s7 = smov 2   ;;  %s1418_s0 = inlined_call_operand.vmem [shape: f32[8,4], index: 0, kind: input, shape index: {}]   ;;  %s1419_s1 = inlined_call_operand.vmem [shape: f32[2,2,50], index: 1, kind: input, shape index: {}]   ;;  %s1420_s2 = inlined_call_operand.vmem [shape: f32[2,1,50], index: 2, kind: input, shape index: {}]   ;;  %s1421_s3 = inlined_call_operand.vmem [shape: f32[2,50,896], index: 3, kind: input, shape index: {}]   ;;  %s1422_s4 = inlined_call_operand.vmem [shape: f32[2,1,896], index: 4, kind: input, shape index: {}]   ;;  %s1423_s5 = inlined_call_operand.vmem [shape: f32[8,4], index: 5, kind: output, shape index: {0}]   ;;  %s1424_s6 = inlined_call_operand.vmem [shape: f32[8,4], index: 6, kind: output, shape index: {1}]  }
   0x1   :  { %v992_v0 = vld [vmem:[%s1418_s0] sm:$0xff]  ;;  %v101_v2 = vld [vmem:[%s1421_s3 + $0x150] sm:$0x3]  ;;  %v102_v3 = vld [vmem:[%s1421_s3 + $0x158] sm:$0x3]  ;;  %912 = vset.pattern.permute.xlu0 %v947_v53  ;;  %913 = vset.pattern.permute.xlu1 %v948_v54  ;;  %vm124_vm2 = vcmask 408576  }
   0x2   :  { %v23_v1 = vld [vmem:[%s1419_s1] sm:$0x3]  ;;  %29 = vrot.lane.b32.xlu0 %v992_v0, %s946_s25  ;;  %816 = vmatpush.msk.msra.mxu1 %vm34_vm0, %v101_v2  ;;  %v94_v5 = vld [vmem:[%s1421_s3 + $0x118] sm:$0xff]  ;;  %v96_v7 = vld [vmem:[%s1421_s3 + $0x128] sm:$0xff]  ;;  %vm321_vm5 = vcmask 7168   ;;  %s951_s8 = smov 4  }
   0x3   :  { %814 = vmatpush.msk.msra.mxu0 %vm34_vm0, %v23_v1  ;;  %v103_v4 = vld [vmem:[%s1421_s3 + $0x160] sm:$0x3]  ;;  %818 = vmatpush.msk.msra.mxu2 %vm34_vm0, %v102_v3  ;;  %v88_v9 = vld [vmem:[%s1421_s3 + $0xe8] sm:$0xff]  ;;  %v89_v10 = vld [vmem:[%s1421_s3 + $0xf0] sm:$0xff]  ;;  %s952_s9 = smov 124  }
   0x4   :  { %v95_v6 = vld [vmem:[%s1421_s3 + $0x120] sm:$0xff]  ;;  %820 = vmatpush.msk.msra.mxu3 %vm34_vm0, %v103_v4  ;;  %159 = vmatpush.msra.mxu1 %v94_v5  ;;  %v104_v11 = vld [vmem:[%s1421_s3 + $0x168] sm:$0x3]  ;;  %v81_v13 = vld [vmem:[%s1421_s3 + $0xb0] sm:$0xff] }
   0x5   :  { %v87_v8 = vld [vmem:[%s1421_s3 + $0xe0] sm:$0xff]  ;;  %179 = vmatpush.msra.mxu2 %v95_v6  ;;  %822 = vmatpush.msk.msrb.mxu0 %vm34_vm0, %v104_v11  ;;  %v80_v12 = vld [vmem:[%s1421_s3 + $0xa8] sm:$0xff]  ;;  %v97_v14 = vld [vmem:[%s1421_s3 + $0x130] sm:$0xff] }
   0x6   :  { %199 = vmatpush.msra.mxu3 %v96_v7  ;;  %160 = vmatpush.msra.mxu1 %v87_v8  ;;  %v82_v15 = vld [vmem:[%s1421_s3 + $0xb8] sm:$0xff]  ;;  %v73_v17 = vld [vmem:[%s1421_s3 + $0x70] sm:$0xff]  ;;  %v75_v19 = vld [vmem:[%s1421_s3 + $0x80] sm:$0xff] }
   0x7   :  { %180 = vmatpush.msra.mxu2 %v88_v9  ;;  %v90_v16 = vld [vmem:[%s1421_s3 + $0xf8] sm:$0xff]  ;;  %219 = vmatpush.msrb.mxu0 %v97_v14  ;;  %v83_v20 = vld [vmem:[%s1421_s3 + $0xc0] sm:$0xff]  ;;  %v68_v23 = vld [vmem:[%s1421_s3 + $0x48] sm:$0xff] }
   0x8   :  { %200 = vmatpush.msra.mxu3 %v89_v10  ;;  %v74_v18 = vld [vmem:[%s1421_s3 + $0x78] sm:$0xff]  ;;  %161 = vmatpush.msra.mxu1 %v80_v12  ;;  %v67_v22 = vld [vmem:[%s1421_s3 + $0x40] sm:$0xff]  ;;  %v60_v25 = vld [vmem:[%s1421_s3 + $0x8] sm:$0xff] }
   0x9   :  { %181 = vmatpush.msra.mxu2 %v81_v13  ;;  %220 = vmatpush.msrb.mxu0 %v90_v16  ;;  %v66_v21 = vld [vmem:[%s1421_s3 + $0x38] sm:$0xff]  ;;  %v59_v24 = vld [vmem:[%s1421_s3] sm:$0xff]  ;;  %v61_v26 = vld [vmem:[%s1421_s3 + $0x10] sm:$0xff]  ;;  %v949_v13 = vmov 2  }
   0xa   :  { %201 = vmatpush.msra.mxu3 %v82_v15  ;;  %162 = vmatpush.msra.mxu1 %v73_v17  ;;  %v76_v28 = vld [vmem:[%s1421_s3 + $0x88] sm:$0xff]  ;;  %v105_v29 = vld [vmem:[%s1421_s3 + $0x170] sm:$0x3]  ;;  %v106_v30 = vld [vmem:[%s1421_s3 + $0x178] sm:$0x3] }
   0xb   :  { %182 = vmatpush.msra.mxu2 %v74_v18  ;;  %221 = vmatpush.msrb.mxu0 %v83_v20  ;;  %v107_v31 = vld [vmem:[%s1421_s3 + $0x180] sm:$0x3]  ;;  %v69_v32 = vld [vmem:[%s1421_s3 + $0x50] sm:$0xff]  ;;  %v98_v33 = vld [vmem:[%s1421_s3 + $0x138] sm:$0xff] }
   0xc   :  { %202 = vmatpush.msra.mxu3 %v75_v19  ;;  %163 = vmatpush.msra.mxu1 %v66_v21  ;;  %v99_v34 = vld [vmem:[%s1421_s3 + $0x140] sm:$0xff]  ;;  %v100_v36 = vld [vmem:[%s1421_s3 + $0x148] sm:$0xff]  ;;  %v62_v37 = vld [vmem:[%s1421_s3 + $0x18] sm:$0xff] }
   0xd   :  { %183 = vmatpush.msra.mxu2 %v67_v22  ;;  %222 = vmatpush.msrb.mxu0 %v76_v28  ;;  %v833_v35 = vld [vmem:[%s1419_s1 + $0x2] sm:$0x3]  ;;  %v92_v39 = vld [vmem:[%s1421_s3 + $0x108] sm:$0xff]  ;;  %v93_v40 = vld [vmem:[%s1421_s3 + $0x110] sm:$0xff] }
   0xe   :  { %203 = vmatpush.msra.mxu3 %v68_v23  ;;  %164 = vmatpush.msra.mxu1 %v59_v24  ;;  %v91_v38 = vld [vmem:[%s1421_s3 + $0x100] sm:$0xff]  ;;  %v84_v41 = vld [vmem:[%s1421_s3 + $0xc8] sm:$0xff]  ;;  %v85_v42 = vld [vmem:[%s1421_s3 + $0xd0] sm:$0xff] }
   0xf   :  { %184 = vmatpush.msra.mxu2 %v60_v25  ;;  %223 = vmatpush.msrb.mxu0 %v69_v32  ;;  %v86_v43 = vld [vmem:[%s1421_s3 + $0xd8] sm:$0xff]  ;;  %v77_v44 = vld [vmem:[%s1421_s3 + $0x90] sm:$0xff]  ;;  %v79_v46 = vld [vmem:[%s1421_s3 + $0xa0] sm:$0xff] }
  0x10   :  { %204 = vmatpush.msra.mxu3 %v61_v26  ;;  %824 = vmatpush.msk.msrb.mxu1 %vm34_vm0, %v105_v29  ;;  %v78_v45 = vld [vmem:[%s1421_s3 + $0x98] sm:$0xff]  ;;  %v71_v48 = vld [vmem:[%s1421_s3 + $0x60] sm:$0xff]  ;;  %v72_v49 = vld [vmem:[%s1421_s3 + $0x68] sm:$0xff] }
  0x11   :  { %826 = vmatpush.msk.msrb.mxu2 %vm34_vm0, %v106_v30  ;;  %224 = vmatpush.msrb.mxu0 %v62_v37  ;;  %v70_v47 = vld [vmem:[%s1421_s3 + $0x58] sm:$0xff]  ;;  %v63_v50 = vld [vmem:[%s1421_s3 + $0x20] sm:$0xff]  ;;  %v64_v51 = vld [vmem:[%s1421_s3 + $0x28] sm:$0xff] }
  0x12   :  { %828 = vmatpush.msk.msrb.mxu3 %vm34_vm0, %v107_v31  ;;  %239 = vmatpush.msrb.mxu1 %v98_v33  ;;  %v65_v52 = vld [vmem:[%s1421_s3 + $0x30] sm:$0xff]  ;;  %v916_v55 = vld [vmem:[%s1420_s2] ss:$0 sm:$0xff] }
  0x13   :  { %259 = vmatpush.msrb.mxu2 %v99_v34  ;;  %290 = vperm.xlu0 %912, %v992_v0   ;;  %v1174_v59 = vld [vmem:[%s1422_s4] sm:$0xff] }
  0x14   :  { %279 = vmatpush.msrb.mxu3 %v100_v36  ;;  %240 = vmatpush.msrb.mxu1 %v91_v38  ;;  %v110_v60 = vperm.slane %v1174_v59, 0  ;;  %v111_v62 = vperm.slane %v1174_v59, 1  ;;  %v112_v1 = vperm.slane %v1174_v59, 2  ;;  %v113_v2 = vperm.slane %v1174_v59, 3 }
  0x15   :  { %260 = vmatpush.msrb.mxu2 %v92_v39  ;;  %294 = vperm.xlu1 %913, %v992_v0   ;;  %v114_v5 = vperm.slane %v1174_v59, 4  ;;  %v115_v20 = vperm.slane %v1174_v59, 5 }
  0x16   :  { %280 = vmatpush.msrb.mxu3 %v93_v40  ;;  %241 = vmatpush.msrb.mxu1 %v84_v41 }
  0x17   :  { %261 = vmatpush.msrb.mxu2 %v85_v42 }
  0x18   :  { %281 = vmatpush.msrb.mxu3 %v86_v43  ;;  %242 = vmatpush.msrb.mxu1 %v77_v44 }
  0x19   :  { %262 = vmatpush.msrb.mxu2 %v78_v45 }
  0x1a   :  { %282 = vmatpush.msrb.mxu3 %v79_v46  ;;  %243 = vmatpush.msrb.mxu1 %v70_v47 }
  0x1b   :  { %263 = vmatpush.msrb.mxu2 %v71_v48 }
  0x1c   :  { %283 = vmatpush.msrb.mxu3 %v72_v49  ;;  %244 = vmatpush.msrb.mxu1 %v63_v50  ;;  %v116_v50 = vperm.slane %v1174_v59, 6 }
  0x1d   :  { %264 = vmatpush.msrb.mxu2 %v64_v51  ;;  %914 = vset.pattern.permute.xlu1 %v949_v13 }
  0x1e   :  { %284 = vmatpush.msrb.mxu3 %v65_v52 }
  0x74   :  { %v30_v27 = vpop.permute.xlu0 %29 }
  0x75   :  { %815 = vmatmul.msk.f32.vlgmr.msra.gmra.mxu0 %vm31_vm1, %v30_v27 }
  0x76   :  { %835 = vmatpush.msk.msra.mxu0 %vm34_vm0, %v833_v35 }
  0x85   :  { %v291_v3 = vpop.permute.xlu0 %290 }
  0x87   :  { %v295_v4 = vpop.permute.xlu1 %294 }
  0xf2   :  { %v55_v56 = vpop.f32.mrf.mxu0 }
  0xf3   :  { %v56_v57 = vadd.f32 %v916_v55, %v55_v56 }
  0xf5   :  { %v58_v58 = vmax.f32 %v56_v57, 0.0 }
  0xf7   :  { %817 = vmatmul.msk.f32.vlgmr.msra.gmra.mxu1 %vm124_vm2, %v58_v58  ;;  %819 = vmatmul.msk.f32.vlgmr.msra.gmra.mxu2 %vm124_vm2, %v58_v58 }
  0xf8   :  { %821 = vmatmul.msk.f32.vlgmr.msra.gmra.mxu3 %vm124_vm2, %v58_v58  ;;  %823 = vmatmul.msk.f32.vlgmr.msrb.gmra.mxu0 %vm124_vm2, %v58_v58 }
  0xff   :  { %825 = vmatmul.msk.f32.vlgmr.msrb.gmra.mxu1 %vm124_vm2, %v58_v58  ;;  %827 = vmatmul.msk.f32.vlgmr.msrb.gmra.mxu2 %vm124_vm2, %v58_v58 }
 0x100   :  { %829 = vmatmul.msk.f32.vlgmr.msrb.gmra.mxu3 %vm124_vm2, %v58_v58 }
 0x174   :  { %v166_v61 = vpop.f32.mrf.mxu1 }
 0x175   :  { %v167_v63 = vadd.f32 %v166_v61, %v110_v60  ;;  %v226_v6 = vpop.f32.mrf.mxu0 }
 0x176   :  { %v227_v14 = vadd.f32 %v226_v6, %v113_v2 }
 0x177   :  { %v297_v10 = vmul.f32 %v291_v3, %v167_v63 }
 0x17a   :  { %v186_v7 = vpop.f32.mrf.mxu2 }
 0x17b   :  { %v187_v8 = vadd.f32 %v186_v7, %v111_v62  ;;  %v206_v9 = vpop.f32.mrf.mxu3 }
 0x17c   :  { %v207_v11 = vadd.f32 %v206_v9, %v112_v1  ;;  %v246_v12 = vpop.f32.mrf.mxu1 }
 0x17d   :  { %v298_v15 = vmul.f32 %v295_v4, %v187_v8  ;;  %v247_v16 = vadd.f32 %v246_v12, %v114_v5 }
 0x17e   :  { %v299_v17 = vadd.f32 %v297_v10, %v207_v11 }
 0x17f   :  { %v300_v18 = vadd.f32 %v298_v15, %v227_v14  ;;  %v313_v19 = vmul.f32 %v247_v16, %v167_v63 }
 0x180   :  { %v301_v21 = vmin.f32 %v299_v17, 0.0  ;;  %vm307_vm3 = vcmp.gt.f32.partialorder %v299_v17, 0.0 }
 0x181   :  { %v302_v22 = vmin.f32 %v300_v18, 0.0  ;;  %v330_v23 = vsub.f32 0.0, %v313_v19  ;;  %vm308_vm4 = vcmp.gt.f32.partialorder %v300_v18, 0.0 }
 0x182   :  { %v303_v24 = vmul.f32 1.442695, %v301_v21  ;;  %v266_v25 = vpop.f32.mrf.mxu2  ;;  %v874_v21 = vld [vmem:[%s1421_s3 + $0x2b0] sm:$0xff] }
 0x183   :  { %v305_v26 = vmul.f32 1.442695, %v302_v22  ;;  %v267_v27 = vadd.f32 %v266_v25, %v115_v20  ;;  %v332_v28 = vmax.f32 %v330_v23, 0.0  ;;  %v286_v51 = vpop.f32.mrf.mxu3  ;;  %v873_v20 = vld [vmem:[%s1421_s3 + $0x2a8] sm:$0xff]  ;;  %v866_v23 = vld [vmem:[%s1421_s3 + $0x270] sm:$0xff] }
 0x184   :  { %918 = vpow2.f32 %v303_v24  ;;  %v1190_v52 = vadd.f32 %v286_v51, %v116_v50  ;;  %v865_v22 = vld [vmem:[%s1421_s3 + $0x268] sm:$0xff]  ;;  %v867_v24 = vld [vmem:[%s1421_s3 + $0x278] sm:$0xff]  ;;  %v882_v25 = vld [vmem:[%s1421_s3 + $0x2f0] sm:$0x3] }
 0x185   :  { %920 = vpow2.f32 %v305_v26  ;;  %334 = vadd.xlane.f32.xlu1 %v332_v28  ;;  %v314_v29 = vmul.f32 %v267_v27, %v187_v8  ;;  %893 = vmatpush.msk.msra.mxu3 %vm34_vm0, %v882_v25  ;;  %v858_v26 = vld [vmem:[%s1421_s3 + $0x230] sm:$0xff]  ;;  %v875_v28 = vld [vmem:[%s1421_s3 + $0x2b8] sm:$0xff]  ;;  %v840_v51 = vld [vmem:[%s1421_s3 + $0x1a0] sm:$0xff] }
 0x186   :  { %v832_v53 = vmul.f32 -1.442695, %v1190_v52  ;;  %v366_v10 = vmul.f32 1.442695, %v1190_v52  ;;  %v878_v50 = vld [vmem:[%s1421_s3 + $0x2d0] sm:$0xff] }
 0x187   :  { %v331_v30 = vsub.f32 0.0, %v314_v29  ;;  %604 = vmatpush.msra.mxu3 %v875_v28 }
 0x189   :  { %v333_v31 = vmax.f32 %v331_v30, 0.0  ;;  %v868_v30 = vld [vmem:[%s1421_s3 + $0x280] sm:$0xff] }
 0x18a   :  { %v919_v32 = vpop.eup %918  ;;  %605 = vmatpush.msra.mxu3 %v868_v30 }
 0x18b   :  { %v921_v33 = vpop.eup %920  ;;  %336 = vadd.xlane.f32.xlu2 %v333_v31  ;;  %v830_v34 = vadd.f32 -1.0, %v919_v32  ;;  %v323_v41 = vmul.f32 %v919_v32, %v313_v19  ;;  %v872_v19 = vld [vmem:[%s1421_s3 + $0x2a0] sm:$0xff]  ;;  %v851_v31 = vld [vmem:[%s1421_s3 + $0x1f8] sm:$0xff] }
 0x18c   :  { %v1182_v35 = vmul.f32 %v921_v33, %v314_v29  ;;  %v831_v38 = vadd.f32 -1.0, %v921_v33  ;;  %v860_v29 = vld [vmem:[%s1421_s3 + $0x240] sm:$0xff]  ;;  %v853_v33 = vld [vmem:[%s1421_s3 + $0x208] sm:$0xff] }
 0x18d   :  { %v311_v36 = vsel %vm307_vm3, %v299_v17, %v830_v34  ;;  %v880_v17 = vld [vmem:[%s1421_s3 + $0x2e0] sm:$0x3]  ;;  %v861_v34 = vld [vmem:[%s1421_s3 + $0x248] sm:$0xff]  ;;  %vm803_vm3 = vcmask 31744  }
 0x18e   :  { %v315_v37 = vmul.f32 %v311_v36, %v247_v16  ;;  %v312_v39 = vsel %vm308_vm4, %v300_v18, %v831_v38  ;;  %v879_v16 = vld [vmem:[%s1421_s3 + $0x2d8] sm:$0x3]  ;;  %v881_v18 = vld [vmem:[%s1421_s3 + $0x2e8] sm:$0x3]  ;;  %889 = vmatpush.msk.msra.mxu1 %vm34_vm0, %v880_v17  ;;  %v852_v32 = vld [vmem:[%s1421_s3 + $0x200] sm:$0xff]  ;;  %606 = vmatpush.msra.mxu3 %v861_v34 }
 0x18f   :  { %v316_v40 = vmul.f32 %v312_v39, %v267_v27  ;;  %887 = vmatpush.msk.msrb.mxu0 %vm34_vm0, %v879_v16  ;;  %891 = vmatpush.msk.msra.mxu2 %vm34_vm0, %v881_v18  ;;  %v859_v27 = vld [vmem:[%s1421_s3 + $0x238] sm:$0xff]  ;;  %v844_v36 = vld [vmem:[%s1421_s3 + $0x1c0] sm:$0xff]  ;;  %v846_v38 = vld [vmem:[%s1421_s3 + $0x1d0] sm:$0xff] }
 0x190   :  { %564 = vmatpush.msra.mxu1 %v873_v20  ;;  %v837_v39 = vld [vmem:[%s1421_s3 + $0x188] sm:$0xff] }
 0x191   :  { %544 = vmatpush.msrb.mxu0 %v872_v19  ;;  %584 = vmatpush.msra.mxu2 %v874_v21 }
 0x192   :  { %565 = vmatpush.msra.mxu1 %v866_v23 }
 0x193   :  { %317 = vadd.xlane.f32.xlu2 %v315_v37  ;;  %545 = vmatpush.msrb.mxu0 %v865_v22  ;;  %v845_v37 = vld [vmem:[%s1421_s3 + $0x1c8] sm:$0xff] }
 0x194   :  { %585 = vmatpush.msra.mxu2 %v867_v24  ;;  %566 = vmatpush.msra.mxu1 %v859_v27 }
 0x195   :  { %546 = vmatpush.msrb.mxu0 %v858_v26 }
 0x196   :  { %586 = vmatpush.msra.mxu2 %v860_v29  ;;  %567 = vmatpush.msra.mxu1 %v852_v32 }
 0x197   :  { %547 = vmatpush.msrb.mxu0 %v851_v31 }
 0x198   :  { %587 = vmatpush.msra.mxu2 %v853_v33  ;;  %568 = vmatpush.msra.mxu1 %v845_v37 }
 0x199   :  { %548 = vmatpush.msrb.mxu0 %v844_v36 }
 0x19a   :  { %588 = vmatpush.msra.mxu2 %v846_v38 }
 0x19b   :  { %319 = vadd.xlane.f32.xlu2 %v316_v40  ;;  %v838_v40 = vld [vmem:[%s1421_s3 + $0x190] sm:$0xff]  ;;  %549 = vmatpush.msrb.mxu0 %v837_v39 }
 0x19c   :  { %569 = vmatpush.msra.mxu1 %v838_v40 }
 0x19e   :  { %675 = vperm.xlu1 %914, %v992_v0  }
 0x1c8   :  { %325 = vadd.xlane.f32.xlu1 %v323_v41  ;;  %v839_v41 = vld [vmem:[%s1421_s3 + $0x198] sm:$0xff] }
 0x1c9   :  { %589 = vmatpush.msra.mxu2 %v839_v41 }
 0x1f8   :  { %v335_v42 = vpop.xlane.xlu1 %334 }
 0x1fe   :  { %v337_v43 = vpop.xlane.xlu2 %336 }
 0x1ff   :  { %v338_v44 = vsel %vm321_vm5, %v335_v42, %v337_v43  ;;  %v854_v43 = vld [vmem:[%s1421_s3 + $0x210] sm:$0xff] }
 0x200   :  { %v339_v45 = vadd.f32 1.0, %v338_v44  ;;  %v883_v44 = vld [vmem:[%s1421_s3 + $0x2f8] sm:$0x3]  ;;  %607 = vmatpush.msra.mxu3 %v854_v43 }
 0x202   :  { %922 = vrcp.f32 %v339_v45  ;;  %v884_v45 = vld [vmem:[%s1421_s3 + $0x300] sm:$0x3] }
 0x203   :  { %924 = vpow2.f32 %v832_v53  ;;  %897 = vmatpush.msk.msrb.mxu1 %vm34_vm0, %v884_v45  ;;  %v869_v53 = vld [vmem:[%s1421_s3 + $0x288] sm:$0xff] }
 0x206   :  { %v318_v46 = vpop.xlane.xlu2 %317 }
 0x208   :  { %v923_v47 = vpop.eup %922 }
 0x209   :  { %362 = vrot.lane.b32.xlu0 %v923_v47, %s950_s7  ;;  %v925_v54 = vpop.eup %924  ;;  %v847_v47 = vld [vmem:[%s1421_s3 + $0x1d8] sm:$0xff] }
 0x20a   :  { %v343_v55 = vadd.f32 1.0, %v925_v54  ;;  %608 = vmatpush.msra.mxu3 %v847_v47  ;;  %v870_v54 = vld [vmem:[%s1421_s3 + $0x290] sm:$0xff] }
 0x20c   :  { %926 = vrcp.f32 %v343_v55  ;;  %v355_v62 = vand.u32 2147483648, %v343_v55  ;;  %vm349_vm7 = vweird.f32 %v343_v55  ;;  %v353_v63 = vand.u32 2147483647, %v343_v55  ;;  %609 = vmatpush.msra.mxu3 %v840_v51 }
 0x20d   :  { %928 = vpow2.f32 %v366_v10 }
 0x20e   :  { %v320_v48 = vpop.xlane.xlu2 %319  ;;  %v356_v1 = vor.u32 1.1754944e-38, %v355_v62  ;;  %vm354_vm9 = vcmp.eq.f32.partialorder %v353_v63, 8.507059e+37  ;;  %v857_v62 = vld [vmem:[%s1421_s3 + $0x228] sm:$0xff]  ;;  %v848_v63 = vld [vmem:[%s1421_s3 + $0x1e0] sm:$0xff] }
 0x20f   :  { %v322_v49 = vsel %vm321_vm5, %v318_v46, %v320_v48  ;;  %v885_v46 = vld [vmem:[%s1421_s3 + $0x308] sm:$0x3]  ;;  %v876_v48 = vld [vmem:[%s1421_s3 + $0x2c0] sm:$0xff] }
 0x210   :  { %369 = vrot.lane.b32.xlu2 %v322_v49, %s950_s7  ;;  %899 = vmatpush.msk.msrb.mxu2 %vm34_vm0, %v885_v46  ;;  %v877_v49 = vld [vmem:[%s1421_s3 + $0x2c8] sm:$0xff]  ;;  %v676_v23 = vpop.permute.xlu1 %675 }
 0x211   :  { %644 = vmatpush.msrb.mxu1 %v877_v49 }
 0x212   :  { %v927_v56 = vpop.eup %926  ;;  %664 = vmatpush.msrb.mxu2 %v878_v50 }
 0x213   :  { %v345_v57 = vmul.f32 %v927_v56, %v343_v55  ;;  %vm350_vm6 = vweird.f32 %v927_v56  ;;  %v929_v12 = vpop.eup %928  ;;  %v871_v55 = vld [vmem:[%s1421_s3 + $0x298] sm:$0xff]  ;;  %645 = vmatpush.msrb.mxu1 %v870_v54 }
 0x214   :  { %vm351_vm8 = vmor %vm349_vm7, %vm350_vm6  ;;  %665 = vmatpush.msrb.mxu2 %v871_v55 }
 0x215   :  { %v346_v58 = vsub.f32 1.0, %v345_v57  ;;  %v863_v57 = vld [vmem:[%s1421_s3 + $0x258] sm:$0xff] }
 0x216   :  { %646 = vmatpush.msrb.mxu1 %v863_v57 }
 0x217   :  { %v347_v60 = vmul.f32 %v927_v56, %v346_v58  ;;  %v864_v58 = vld [vmem:[%s1421_s3 + $0x260] sm:$0xff] }
 0x218   :  { %666 = vmatpush.msrb.mxu2 %v864_v58 }
 0x219   :  { %v348_v61 = vadd.f32 %v927_v56, %v347_v60  ;;  %v855_v60 = vld [vmem:[%s1421_s3 + $0x218] sm:$0xff] }
 0x21a   :  { %667 = vmatpush.msrb.mxu2 %v857_v62 }
 0x21b   :  { %v352_v59 = vsel %vm351_vm8, %v927_v56, %v348_v61  ;;  %v862_v56 = vld [vmem:[%s1421_s3 + $0x250] sm:$0xff]  ;;  %v856_v61 = vld [vmem:[%s1421_s3 + $0x220] sm:$0xff] }
 0x21c   :  { %v357_v2 = vsel %vm354_vm9, %v356_v1, %v352_v59  ;;  %v849_v59 = vld [vmem:[%s1421_s3 + $0x1e8] sm:$0xff]  ;;  %v850_v1 = vld [vmem:[%s1421_s3 + $0x1f0] sm:$0xff]  ;;  %647 = vmatpush.msrb.mxu1 %v856_v61 }
 0x21d   :  { %v359_v3 = vmul.f32 0.8, %v357_v2  ;;  %v841_v2 = vld [vmem:[%s1421_s3 + $0x1a8] sm:$0xff]  ;;  %668 = vmatpush.msrb.mxu2 %v850_v1 }
 0x21e   :  { %648 = vmatpush.msrb.mxu1 %v849_v59 }
 0x23b   :  { %v326_v59 = vpop.xlane.xlu1 %325 }
 0x26a   :  { %v370_v6 = vpop.permute.xlu2 %369 }
 0x27b   :  { %v363_v4 = vpop.permute.xlu0 %362 }
 0x27c   :  { %v1193_v5 = vmul.f32 %v363_v4, %v359_v3  ;;  %v842_v3 = vld [vmem:[%s1421_s3 + $0x1b0] sm:$0xff]  ;;  %v843_v4 = vld [vmem:[%s1421_s3 + $0x1b8] sm:$0xff] }
 0x27d   :  { %649 = vmatpush.msrb.mxu1 %v842_v3  ;;  %669 = vmatpush.msrb.mxu2 %v843_v4 }
 0x27e   :  { %v372_v7 = vmul.f32 %v370_v6, %v1193_v5  ;;  %v953_v6 = vmov 3  }
 0x27f   :  { %915 = vset.pattern.permute.xlu0 %v953_v6 }
 0x280   :  { %374 = vrot.lane.b32.xlu0 %v372_v7, %s946_s25  ;;  %v917_v7 = vld [vmem:[%s1420_s2 + $0x1] ss:$0 sm:$0xff] }
 0x2f2   :  { %v375_v8 = vpop.permute.xlu0 %374 }
 0x2f3   :  { %v377_v9 = vadd.f32 %v375_v8, %v992_v0 }
 0x2f5   :  { %379 = vrot.lane.b32.xlu0 %v377_v9, %s951_s8 }
 0x2fd   :  { %384 = vrot.lane.b32.xlu0 %v1190_v52, %s951_s8 }
 0x305   :  { %679 = vperm.xlu0 %915, %v992_v0  }
 0x367   :  { %v380_v11 = vpop.permute.xlu0 %379 }
 0x368   :  { %v382_v13 = vmul.f32 %v929_v12, %v380_v11  ;;  %v1375_v11 = vld [vmem:[%s1422_s4 + $0x7] sm:$0xff] }
 0x369   :  { %v496_v12 = vperm.slane %v1375_v11, 0  ;;  %v498_v18 = vperm.slane %v1375_v11, 2  ;;  %v499_v19 = vperm.slane %v1375_v11, 3  ;;  %v500_v21 = vperm.slane %v1375_v11, 4 }
 0x36a   :  { %v501_v22 = vperm.slane %v1375_v11, 5 }
 0x36f   :  { %v385_v14 = vpop.permute.xlu0 %384 }
 0x370   :  { %v387_v15 = vadd.f32 %v385_v14, %v382_v13  ;;  %v497_v14 = vperm.slane %v1375_v11, 1 }
 0x372   :  { %415 = vrot.lane.b32.xlu2 %v387_v15, %s952_s9 }
 0x377   :  { %v680_v20 = vpop.permute.xlu0 %679 }
 0x3cc   :  { %v1282_v42 = vpop.permute.xlu2 %415 }
 0x3cd   :  { %836 = vmatmul.msk.f32.vlgmr.msra.gmra.mxu0 %vm31_vm1, %v1282_v42 }
 0x3ce   :  { %895 = vmatpush.msk.msra.mxu0 %vm34_vm0, %v883_v44 }
 0x3d0   :  { %624 = vmatpush.msra.mxu0 %v876_v48 }
 0x3d2   :  { %625 = vmatpush.msra.mxu0 %v869_v53 }
 0x3d4   :  { %626 = vmatpush.msra.mxu0 %v862_v56 }
 0x3d6   :  { %627 = vmatpush.msra.mxu0 %v855_v60 }
 0x3d8   :  { %628 = vmatpush.msra.mxu0 %v848_v63 }
 0x3da   :  { %629 = vmatpush.msra.mxu0 %v841_v2 }
 0x44a   :  { %v439_v8 = vpop.f32.mrf.mxu0 }
 0x44b   :  { %v440_v9 = vadd.f32 %v917_v7, %v439_v8 }
 0x44d   :  { %v442_v10 = vmax.f32 %v440_v9, 0.0 }
 0x44f   :  { %888 = vmatmul.msk.f32.vlgmr.msrb.gmra.mxu0 %vm124_vm2, %v442_v10  ;;  %890 = vmatmul.msk.f32.vlgmr.msra.gmra.mxu1 %vm124_vm2, %v442_v10 }
 0x450   :  { %892 = vmatmul.msk.f32.vlgmr.msra.gmra.mxu2 %vm124_vm2, %v442_v10  ;;  %894 = vmatmul.msk.f32.vlgmr.msra.gmra.mxu3 %vm124_vm2, %v442_v10 }
 0x457   :  { %896 = vmatmul.msk.f32.vlgmr.msra.gmra.mxu0 %vm124_vm2, %v442_v10  ;;  %898 = vmatmul.msk.f32.vlgmr.msrb.gmra.mxu1 %vm124_vm2, %v442_v10 }
 0x458   :  { %900 = vmatmul.msk.f32.vlgmr.msrb.gmra.mxu2 %vm124_vm2, %v442_v10  ;;  %v502_v10 = vperm.slane %v1375_v11, 6 }
 0x4cc   :  { %v551_v13 = vpop.f32.mrf.mxu0  ;;  %v571_v15 = vpop.f32.mrf.mxu1 }
 0x4cd   :  { %v552_v16 = vadd.f32 %v551_v13, %v496_v12  ;;  %v572_v17 = vadd.f32 %v571_v15, %v497_v14 }
 0x4cf   :  { %v682_v26 = vmul.f32 %v676_v23, %v552_v16  ;;  %v683_v27 = vmul.f32 %v680_v20, %v572_v17 }
 0x4d3   :  { %v591_v24 = vpop.f32.mrf.mxu2  ;;  %v611_v25 = vpop.f32.mrf.mxu3 }
 0x4d4   :  { %v592_v28 = vadd.f32 %v591_v24, %v498_v18  ;;  %v612_v29 = vadd.f32 %v611_v25, %v499_v19  ;;  %v631_v30 = vpop.f32.mrf.mxu0  ;;  %v651_v31 = vpop.f32.mrf.mxu1 }
 0x4d5   :  { %v632_v32 = vadd.f32 %v631_v30, %v500_v21  ;;  %v652_v33 = vadd.f32 %v651_v31, %v501_v22 }
 0x4d6   :  { %v684_v34 = vadd.f32 %v682_v26, %v592_v28  ;;  %v685_v36 = vadd.f32 %v683_v27, %v612_v29 }
 0x4d7   :  { %v698_v37 = vmul.f32 %v632_v32, %v552_v16  ;;  %v699_v38 = vmul.f32 %v652_v33, %v572_v17 }
 0x4d8   :  { %v686_v39 = vmin.f32 %v684_v34, 0.0  ;;  %v687_v40 = vmin.f32 %v685_v36, 0.0  ;;  %vm692_vm10 = vcmp.gt.f32.partialorder %v684_v34, 0.0  ;;  %vm693_vm11 = vcmp.gt.f32.partialorder %v685_v36, 0.0 }
 0x4d9   :  { %v715_v41 = vsub.f32 0.0, %v699_v38  ;;  %v714_v43 = vsub.f32 0.0, %v698_v37 }
 0x4da   :  { %v688_v44 = vmul.f32 1.442695, %v686_v39  ;;  %v690_v45 = vmul.f32 1.442695, %v687_v40 }
 0x4db   :  { %v717_v46 = vmax.f32 %v715_v41, 0.0  ;;  %v716_v47 = vmax.f32 %v714_v43, 0.0  ;;  %v671_v12 = vpop.f32.mrf.mxu2 }
 0x4dc   :  { %930 = vpow2.f32 %v688_v44  ;;  %v1393_v13 = vadd.f32 %v671_v12, %v502_v10 }
 0x4dd   :  { %932 = vpow2.f32 %v690_v45  ;;  %720 = vadd.xlane.f32.xlu0 %v717_v46  ;;  %718 = vadd.xlane.f32.xlu2 %v716_v47 }
 0x4de   :  { %v903_v14 = vmul.f32 -1.442695, %v1393_v13 }
 0x4e2   :  { %v931_v48 = vpop.eup %930 }
 0x4e3   :  { %v933_v49 = vpop.eup %932  ;;  %v901_v50 = vadd.f32 -1.0, %v931_v48  ;;  %v707_v57 = vmul.f32 %v931_v48, %v698_v37 }
 0x4e4   :  { %v902_v51 = vadd.f32 -1.0, %v933_v49  ;;  %v708_v58 = vmul.f32 %v933_v49, %v699_v38 }
 0x4e5   :  { %327 = vadd.xlane.f32.xlu2 %v1182_v35  ;;  %v696_v53 = vsel %vm692_vm10, %v684_v34, %v901_v50 }
 0x4e6   :  { %v700_v54 = vmul.f32 %v696_v53, %v632_v32  ;;  %v697_v55 = vsel %vm693_vm11, %v685_v36, %v902_v51  ;;  %v750_v53 = vmul.f32 1.442695, %v1393_v13 }
 0x4e7   :  { %v701_v56 = vmul.f32 %v697_v55, %v652_v33 }
 0x4e8   :  { %702 = vadd.xlane.f32.xlu0 %v700_v54 }
 0x4e9   :  { %704 = vadd.xlane.f32.xlu1 %v701_v56 }
 0x4ed   :  { %709 = vadd.xlane.f32.xlu2 %v707_v57 }
 0x4f5   :  { %711 = vadd.xlane.f32.xlu2 %v708_v58 }
 0x550   :  { %v719_v60 = vpop.xlane.xlu2 %718  ;;  %v721_v61 = vpop.xlane.xlu0 %720 }
 0x551   :  { %v722_v62 = vsel %vm321_vm5, %v719_v60, %v721_v61 }
 0x552   :  { %v723_v63 = vadd.f32 1.0, %v722_v62 }
 0x554   :  { %934 = vrcp.f32 %v723_v63 }
 0x555   :  { %936 = vpow2.f32 %v903_v14 }
 0x558   :  { %v328_v1 = vpop.xlane.xlu2 %327 }
 0x559   :  { %v329_v35 = vsel %vm321_vm5, %v326_v59, %v328_v1 }
 0x55a   :  { %v935_v2 = vpop.eup %934  ;;  %389 = vrot.lane.b32.xlu0 %v329_v35, %s950_s7 }
 0x55b   :  { %746 = vrot.lane.b32.xlu2 %v935_v2, %s950_s7  ;;  %v703_v4 = vpop.xlane.xlu0 %702  ;;  %v937_v15 = vpop.eup %936 }
 0x55c   :  { %v705_v3 = vpop.xlane.xlu1 %704  ;;  %v727_v16 = vadd.f32 1.0, %v937_v15 }
 0x55d   :  { %v706_v7 = vsel %vm321_vm5, %v703_v4, %v705_v3 }
 0x55e   :  { %938 = vrcp.f32 %v727_v16  ;;  %v739_v22 = vand.u32 2147483648, %v727_v16  ;;  %vm733_vm13 = vweird.f32 %v727_v16  ;;  %v737_v11 = vand.u32 2147483647, %v727_v16 }
 0x560   :  { %v710_v6 = vpop.xlane.xlu2 %709  ;;  %v740_v24 = vor.u32 1.1754944e-38, %v739_v22  ;;  %vm738_vm15 = vcmp.eq.f32.partialorder %v737_v11, 8.507059e+37 }
 0x562   :  { %753 = vrot.lane.b32.xlu0 %v706_v7, %s950_s7 }
 0x564   :  { %v939_v17 = vpop.eup %938 }
 0x565   :  { %v729_v18 = vmul.f32 %v939_v17, %v727_v16  ;;  %vm734_vm12 = vweird.f32 %v939_v17 }
 0x566   :  { %vm735_vm14 = vmor %vm733_vm13, %vm734_vm12 }
 0x567   :  { %v730_v19 = vsub.f32 1.0, %v729_v18 }
 0x568   :  { %v712_v8 = vpop.xlane.xlu2 %711 }
 0x569   :  { %v713_v9 = vsel %vm321_vm5, %v710_v6, %v712_v8  ;;  %v731_v20 = vmul.f32 %v939_v17, %v730_v19 }
 0x56a   :  { %769 = vrot.lane.b32.xlu1 %v713_v9, %s950_s7 }
 0x56b   :  { %v732_v21 = vadd.f32 %v939_v17, %v731_v20 }
 0x56d   :  { %v736_v23 = vsel %vm735_vm14, %v939_v17, %v732_v21 }
 0x56e   :  { %v741_v27 = vsel %vm738_vm15, %v740_v24, %v736_v23 }
 0x56f   :  { %v743_v31 = vmul.f32 0.8, %v741_v27 }
 0x572   :  { %764 = vrot.lane.b32.xlu1 %v1393_v13, %s951_s8 }
 0x5b5   :  { %v747_v29 = vpop.permute.xlu2 %746 }
 0x5b6   :  { %v749_v32 = vmul.f32 %v747_v29, %v743_v31 }
 0x5cc   :  { %v390_v25 = vpop.permute.xlu0 %389 }
 0x5cd   :  { %v392_v26 = vmul.f32 %v390_v25, %v1193_v5 }
 0x5cf   :  { %v393_v28 = vadd.f32 1.0, %v392_v26  ;;  %v396_v30 = vmul.f32 -0.5, %v392_v26  ;;  %v399_v37 = vand.u32 2147483647, %v392_v26 }
 0x5d1   :  { %940 = vlog2.f32 %v393_v28  ;;  %v397_v34 = vadd.f32 1.0, %v396_v30  ;;  %vm400_vm0 = vcmp.lt.f32.partialorder %v399_v37, 0.0004427343 }
 0x5d3   :  { %v398_v41 = vmul.f32 %v397_v34, %v392_v26 }
 0x5d4   :  { %v754_v33 = vpop.permute.xlu0 %753 }
 0x5d5   :  { %v756_v36 = vmul.f32 %v754_v33, %v749_v32 }
 0x5d7   :  { %v941_v38 = vpop.eup %940  ;;  %v757_v39 = vadd.f32 %v756_v36, %v992_v0 }
 0x5d8   :  { %v395_v40 = vmul.f32 0.6931472, %v941_v38 }
 0x5d9   :  { %759 = vrot.lane.b32.xlu2 %v757_v39, %s950_s7 }
 0x5da   :  { %v401_v5 = vsel %vm400_vm0, %v398_v41, %v395_v40 }
 0x5db   :  { %403 = vrot.lane.b32.xlu0 %v401_v5, %s950_s7 }
 0x5dc   :  { %v770_v43 = vpop.permute.xlu1 %769 }
 0x5dd   :  { %v772_v44 = vmul.f32 %v770_v43, %v749_v32 }
 0x5df   :  { %v773_v45 = vadd.f32 1.0, %v772_v44  ;;  %v776_v46 = vmul.f32 -0.5, %v772_v44  ;;  %v779_v48 = vand.u32 2147483647, %v772_v44 }
 0x5e1   :  { %942 = vlog2.f32 %v773_v45  ;;  %v777_v47 = vadd.f32 1.0, %v776_v46  ;;  %vm780_vm2 = vcmp.lt.f32.partialorder %v779_v48, 0.0004427343 }
 0x5e2   :  { %944 = vpow2.f32 %v750_v53 }
 0x5e3   :  { %v778_v51 = vmul.f32 %v777_v47, %v772_v44 }
 0x5e4   :  { %v765_v57 = vpop.permute.xlu1 %764 }
 0x5e7   :  { %v943_v49 = vpop.eup %942 }
 0x5e8   :  { %v775_v50 = vmul.f32 0.6931472, %v943_v49  ;;  %v945_v54 = vpop.eup %944 }
 0x5ea   :  { %v781_v0 = vsel %vm780_vm2, %v778_v51, %v775_v50 }
 0x5eb   :  { %783 = vrot.lane.b32.xlu2 %v781_v0, %s950_s7 }
 0x633   :  { %v760_v55 = vpop.permute.xlu2 %759 }
 0x634   :  { %v762_v56 = vmul.f32 %v945_v54, %v760_v55 }
 0x636   :  { %v767_v58 = vadd.f32 %v765_v57, %v762_v56 }
 0x638   :  { %789 = vrot.lane.b32.xlu0 %v767_v58, %s946_s25 }
 0x645   :  { %v784_v60 = vpop.permute.xlu2 %783 }
 0x646   :  { %v786_v61 = vadd.f32 %v784_v60, %v1393_v13 }
 0x648   :  { %798 = vrot.lane.b32.xlu2 %v786_v61, %s946_s25 }
 0x64d   :  { %v404_v62 = vpop.permute.xlu0 %403 }
 0x64e   :  { %v406_v63 = vadd.f32 %v404_v62, %v1190_v52 }
 0x650   :  { %794 = vrot.lane.b32.xlu1 %v406_v63, %s952_s9 }
 0x6a2   :  { %v799_v35 = vpop.permute.xlu2 %798 }
 0x6aa   :  { %v790_v59 = vpop.permute.xlu0 %789 }
 0x6ab   :  { %v792_v1 = vsel %vm31_vm1, %v1282_v42, %v790_v59 }
 0x6ac   :  { %804 = vst.msk [vmem:[%s1423_s5] sm:$0xff] %vm803_vm3, %v792_v1 }
 0x6c2   :  { %v795_v2 = vpop.permute.xlu1 %794 }
 0x6c3   :  { %v801_v3 = vsel %vm31_vm1, %v795_v2, %v799_v35 }
 0x6c4   :  { %805 = vst.msk [vmem:[%s1424_s6] sm:$0xff] %vm803_vm3, %v801_v3 }

</bundles_post_ra>
